<compile_context>
chip_gen: v5e
topology: v5e:2x2
jax: 0.10.0
libtpu: 0.0.40
codegen_flags: <defaults>
</compile_context>

<pallas_src>
import math

import numpy as np
import jax
import jax.numpy as jnp
from jax import lax
from jax.experimental import pallas as pl
from jax.experimental.pallas import tpu as pltpu


# ----------------------------- helpers --------------------------------------

def _round_up(x, m):
    return ((x + m - 1) // m) * m


def _vmem_limit_bytes():
    """Per-generation scoped-VMEM budget: <=48 MiB on v7x (64 MiB physical),
    64 MiB on v5e/v6e (128 MiB physical), compiler default elsewhere."""
    try:
        kind = jax.devices()[0].device_kind.lower()
    except Exception:
        return None
    if "v7" in kind:
        return 48 * 1024 * 1024
    if "v5" in kind or "v6" in kind:
        return 64 * 1024 * 1024
    return None


def _row_tile(n):
    """Row tile for the prep kernel: full rows for small N, 128-multiple tiles
    for large N so a double-buffered (tr, N) f32 L block stays within VMEM."""
    if n <= 1024:
        return n
    for t in (1024, 512, 256, 128):
        if n % t == 0:
            return t
    # TODO(synk): pad N to a multiple of 128 for irregular large pathway sizes.
    return n


def _pick_batch_tile(batch, out_pad, max_tile):
    # vreg-pressure cap: keep the live (tb, out_pad) f32 slab at the store
    # under ~128 KiB (feedback item on accumulator spills).
    cap = max(8, (128 * 1024 // (4 * out_pad)) // 8 * 8)
    # aim for >=2 grid steps so the "parallel" batch axis can split across the
    # two v7x TensorCores.
    half = _round_up(max(batch // 2, 1), 8)
    return max(8, min(max_tile, cap, half))


# ----------------------------- Pallas kernels -------------------------------

def _prep_kernel(l_ref, wf_ref, wr_ref, lwt_ref, kzz_ref, kzz_acc):
    """Batch-independent precompute for one pathway k and one L row block r.

    l_ref:   (1, tr, N)  row block of L_k
    wf_ref:  (1, A, N)   full W_k (contraction over all N columns)
    wr_ref:  (1, A, tr)  columns of W_k restricted to this row block
    lwt_ref: (1, tr, A)  output LWT_k row block
    kzz_ref: (1, A, A)   output K_zz_k (written on the last row block)
    kzz_acc: (A, A) f32  VMEM accumulator across row blocks
    """
    r = pl.program_id(1)

    @pl.when(r == 0)
    def _():
        kzz_acc[...] = jnp.zeros_like(kzz_acc)

    # LWT row block: L[k, rows, :] @ W[k]^T (contract shared N axis, no
    # materialized transpose).  HIGHEST precision kept here only: K_zz feeds
    # the numerically sensitive eigh + 1/(sqrt(e)+eps) path.
    # TODO(synk): Precision.HIGH (bf16x3) for this dot if prep dominates at
    # large N; validate against the eigh+eps path first.
    lwt = lax.dot_general(
        l_ref[0], wf_ref[0], (((1,), (1,)), ((), ())),
        preferred_element_type=jnp.float32,
        precision=lax.Precision.HIGHEST)                       # (tr, A)
    lwt_ref[0] = lwt

    # K_zz accumulation over row blocks: W[:, rows] @ LWT[rows, :].
    kzz_acc[...] += jnp.dot(wr_ref[0], lwt,
                            preferred_element_type=jnp.float32,
                            precision=lax.Precision.HIGHEST)   # (A, A)

    @pl.when(r == pl.num_programs(1) - 1)
    def _():
        kzz_ref[0] = kzz_acc[...]


def _project_kernel(x_ref, p_ref, o_ref):
    """Batch-tiled projection; all K pathways folded into each grid step.

    x_ref: (tb, K*N) bf16   pathway slab (torch.cat ordering along lanes)
    p_ref: (K, N, A) bf16   P_k = LWT_k @ lintrans_k
    o_ref: (tb, out_pad) f32, out_pad = round_up(K*A, 128)

    One matmul per pathway (no zero-padded block-diagonal factor), assembled
    in-register and written with a single full-width lane-dense store.
    """
    num_k, n, a = p_ref.shape
    pieces = []
    for k in range(num_k):                         # K is small & static -> unrolled
        xk = x_ref[:, k * n:(k + 1) * n]           # (tb, N) static lane slice
        pieces.append(jnp.dot(xk, p_ref[k],        # (tb, A), f32 MXU accumulation
                              preferred_element_type=jnp.float32))
    pad = o_ref.shape[1] - num_k * a
    if pad:
        pieces.append(jnp.zeros((x_ref.shape[0], pad), jnp.float32))
    o_ref[...] = jnp.concatenate(pieces, axis=-1)  # single (tb, out_pad) store


# ----------------------------- wrappers --------------------------------------

def compute_lwt_kzz(L, W):
    """L: (K, N, N), W: (K, A, N) -> (LWT (K, N, A), KZZ (K, A, A))."""
    K, A, N = W.shape
    tr = _row_tile(N)
    nr = pl.cdiv(N, tr)
    return pl.pallas_call(
        _prep_kernel,
        out_shape=(jax.ShapeDtypeStruct((K, N, A), jnp.float32),
                   jax.ShapeDtypeStruct((K, A, A), jnp.float32)),
        grid=(K, nr),
        in_specs=[
            pl.BlockSpec((1, tr, N), lambda k, r: (k, r, 0)),   # L row block
            pl.BlockSpec((1, A, N), lambda k, r: (k, 0, 0)),    # full W_k
            pl.BlockSpec((1, A, tr), lambda k, r: (k, 0, r)),   # W_k column block
        ],
        out_specs=(
            pl.BlockSpec((1, tr, A), lambda k, r: (k, r, 0)),
            pl.BlockSpec((1, A, A), lambda k, r: (k, 0, 0)),
        ),
        scratch_shapes=[pltpu.VMEM((A, A), jnp.float32)],
        compiler_params=pltpu.CompilerParams(
            dimension_semantics=("parallel", "arbitrary"),
            vmem_limit_bytes=_vmem_limit_bytes()),
    )(L, W, W)


def project(x_cat, p):
    """x_cat: (B, K*N) bf16, p: (K, N, A) bf16 -> (B, K*A) f32."""
    B, KN = x_cat.shape
    K, N, A = p.shape
    assert KN == K * N
    out_cols = K * A
    out_pad = _round_up(out_cols, 128)          # full-width (lane-dense) stores

    vmem_limit = _vmem_limit_bytes()
    max_tile = 1024 if (vmem_limit or 0) >= 64 * 1024 * 1024 else 512
    tb = _pick_batch_tile(B, out_pad, max_tile)
    b_pad = _round_up(B, tb)                    # avoid partial-block remainder path
    if b_pad != B:
        x_cat = jnp.pad(x_cat, ((0, b_pad - B), (0, 0)))
    nb = b_pad // tb

    out = pl.pallas_call(
        _project_kernel,
        out_shape=jax.ShapeDtypeStruct((b_pad, out_pad), jnp.float32),
        grid=(nb,),
        in_specs=[
            pl.BlockSpec((tb, KN), lambda b: (b, 0)),
            # grid-invariant -> fetched once; single buffer reclaims the second
            # pipeline buffer's VMEM.
            pl.BlockSpec((K, N, A), lambda b: (0, 0, 0),
                         pipeline_mode=pl.Buffered(1)),
        ],
        out_specs=pl.BlockSpec((tb, out_pad), lambda b: (b, 0)),
        compiler_params=pltpu.CompilerParams(
            dimension_semantics=("parallel",),   # batch tiles split across v7x TCs
            vmem_limit_bytes=vmem_limit),
    )(x_cat, p)
    return out[:B, :out_cols]


# ----------------------------- JAX glue --------------------------------------

def matrix_inverse_sqrt(a, eps=0.01):
    """K_zz^(-1/2) via eigendecomposition, mirrors torch MatrixInverseSqrt.forward.

    torch.linalg.eigh(..., UPLO='U') only reads the upper triangle, so mirror it.
    """
    # TODO(synk): eigh has no Pallas equivalent; kept as plain JAX (XLA) glue.
    a_sym = jnp.triu(a) + jnp.triu(a, 1).T
    e, v = jnp.linalg.eigh(a_sym)
    e = jnp.clip(e, 0.0, None)
    e_rsqrt = 1.0 / (jnp.sqrt(e) + eps)
    return v @ (v.T * e_rsqrt[:, None])


def _prepare_x(x_in, indices):
    """(B, total) + (K, N) indices -> (B, K*N) slab in torch.cat pathway order.

    Contiguous index range -> pure column slice (no gather pass over x);
    otherwise a single gather emitted directly in concat order (no (K,B,N)
    transpose / re-read).
    """
    flat = indices.reshape(-1)
    try:
        host = np.asarray(jax.device_get(flat))
    except Exception:                       # traced indices -> general gather
        host = None
    if host is not None:
        start = int(host[0])
        if np.array_equal(host, np.arange(start, start + host.size)):
            if start == 0 and host.size == x_in.shape[1]:
                return x_in
            return lax.slice_in_dim(x_in, start, start + host.size, axis=1)
    return jnp.take(x_in, flat, axis=1)


def glpimkl_forward(x_in, indices, L, W):
    """Full GLPIMKLLayer forward.

    x_in:    (B, total_nodes) f32
    indices: (K, N) int32 -- per-pathway node indices
    L:       (K, N, N) f32 -- per-pathway graph Laplacians
    W:       (K, A, N) f32 -- per-pathway anchor points
    returns  (B, K*A) f32
    """
    K, A, N = W.shape

    # Pathway slab in concat order (read directly by the projection kernel).
    x_cat = _prepare_x(x_in, indices)                              # (B, K*N)

    # Pallas prep: LWT_k = L_k @ W_k^T and K_zz_k = W_k @ LWT_k.
    lwt, kzz = compute_lwt_kzz(L, W)

    # lintrans = K_zz^{-1/2} (eigh glue) folded into the projection factor
    # P_k = LWT_k @ lintrans_k -> single matmul per pathway in the batch kernel.
    lintrans = jax.vmap(matrix_inverse_sqrt)(kzz)                  # (K, A, A)
    p = jnp.einsum('kna,kab->knb', lwt, lintrans,
                   precision=lax.Precision.HIGHEST)                # (K, N, A)

    # bf16 operands for the HBM-bound projection (f32 MXU accumulation).
    return project(x_cat.astype(jnp.bfloat16), p.astype(jnp.bfloat16))


# ----------------------------- reference (pure jnp, f32 "golden") ------------

def glpimkl_forward_ref(x_in, indices, L, W):
    hp = lax.Precision.HIGHEST
    outs = []
    for k in range(W.shape[0]):
        x_sel = x_in[:, indices[k]]
        kxz = jnp.dot(jnp.dot(x_sel, L[k], precision=hp), W[k].T, precision=hp)
        kzz = jnp.dot(jnp.dot(W[k], L[k], precision=hp), W[k].T, precision=hp)
        lt = matrix_inverse_sqrt(kzz)
        outs.append(jnp.dot(kxz, lt, precision=hp))
    return jnp.concatenate(outs, axis=1)


# ----------------------------- main ------------------------------------------

if __name__ == "__main__":
    # Small synthetic configuration:
    #   K = 3 pathway kernels, each over N = 16 nodes, A = 8 anchors, batch B = 8.
    #   x_in has 48 total nodes; pathway i uses nodes [16*i, 16*(i+1)).
    K, N, A, B = 3, 16, 8, 8
    total_nodes = K * N

    key = jax.random.PRNGKey(0)
    k_x, k_w, k_l = jax.random.split(key, 3)

    x_in = jax.random.normal(k_x, (B, total_nodes), dtype=jnp.float32)
    indices = jnp.arange(total_nodes, dtype=jnp.int32).reshape(K, N)

    # kaiming_uniform_(a=sqrt(5)) => bound = sqrt(1/fan_in), fan_in = N
    bound = math.sqrt(1.0 / N)
    W = jax.random.uniform(k_w, (K, A, N), jnp.float32, -bound, bound)
    # GLPIMKLLayer.__init__ calls init_params() which re-randomizes L with
    # kaiming_uniform_ (overwriting the provided pi_laplacians), so L is
    # initialized uniformly here as well.
    L = jax.random.uniform(k_l, (K, N, N), jnp.float32, -bound, bound)

    out = jax.block_until_ready(glpimkl_forward(x_in, indices, L, W))
    ref = glpimkl_forward_ref(x_in, indices, L, W)

    assert out.shape == (B, K * A), out.shape
    # The projection kernel now uses bf16 operands with f32 MXU accumulation
    # (per perf review), so compare at bf16-operand accuracy relative to the
    # output scale (lintrans entries are O(1/eps), so outputs are O(10-100)).
    scale = float(jnp.maximum(1.0, jnp.max(jnp.abs(ref))))
    max_err = float(jnp.max(jnp.abs(out - ref)))
    assert max_err <= 5e-2 * scale, (max_err, scale)

    print("KERNEL_OK")
</pallas_src>

<mosaic_0001>
module attributes {stable_mosaic.version = 11 : i64} {
  func.func @_prep_kernel(%arg0: i32, %arg1: i32, %arg2: memref<1x16x16xf32, #tpu.memory_space<vmem>>, %arg3: memref<1x8x16xf32, #tpu.memory_space<vmem>>, %arg4: memref<1x8x16xf32, #tpu.memory_space<vmem>>, %arg5: memref<1x16x8xf32, #tpu.memory_space<vmem>>, %arg6: memref<1x8x8xf32, #tpu.memory_space<vmem>>, %arg7: memref<8x8xf32, #tpu.memory_space<vmem>>) attributes {dimension_semantics = [#tpu.dimension_semantics<parallel>, #tpu.dimension_semantics<arbitrary>], iteration_bounds = array<i64: 3, 1>, scalar_prefetch = 0 : i64, scratch_operands = 1 : i64, tpu.core_type = #tpu.core_type<tc>, window_params = [{transform_indices = @transform_0, window_bounds = array<i64: 1, 16, 16>}, {transform_indices = @transform_1, window_bounds = array<i64: 1, 8, 16>}, {transform_indices = @transform_2, window_bounds = array<i64: 1, 8, 16>}, {transform_indices = @transform_3, window_bounds = array<i64: 1, 16, 8>}, {transform_indices = @transform_4, window_bounds = array<i64: 1, 8, 8>}]} {
    %c0_i32 = arith.constant 0 : i32
    %0 = arith.cmpi eq, %arg1, %c0_i32 : i32
    %1 = arith.extui %0 : i1 to i32
    %c0_i32_0 = arith.constant 0 : i32
    %2 = arith.cmpi ne, %1, %c0_i32_0 : i32
    scf.if %2 {
      %cst_19 = arith.constant 0.000000e+00 : f32
      %20 = vector.broadcast %cst_19 : f32 to vector<8x8xf32>
      %c0_20 = arith.constant 0 : index
      %c0_21 = arith.constant 0 : index
      %21 = vector.load %arg7[%c0_20, %c0_21] : memref<8x8xf32, #tpu.memory_space<vmem>>, vector<8x8xf32>
      tpu.vector_store %arg7[%c0_20, %c0_21], %20 {strides = array<i32>} : memref<8x8xf32, #tpu.memory_space<vmem>>, vector<8x8xf32>,
    } else {
    }
    %c0 = arith.constant 0 : index
    %c0_1 = arith.constant 0 : index
    %c0_2 = arith.constant 0 : index
    %3 = vector.load %arg2[%c0, %c0_1, %c0_2] : memref<1x16x16xf32, #tpu.memory_space<vmem>>, vector<1x16x16xf32>
    %4 = vector.shape_cast %3 : vector<1x16x16xf32> to vector<16x16xf32>
    %c0_3 = arith.constant 0 : index
    %c0_4 = arith.constant 0 : index
    %c0_5 = arith.constant 0 : index
    %5 = vector.load %arg3[%c0_3, %c0_4, %c0_5] : memref<1x8x16xf32, #tpu.memory_space<vmem>>, vector<1x8x16xf32>
    %6 = vector.shape_cast %5 : vector<1x8x16xf32> to vector<8x16xf32>
    %cst = arith.constant dense<0.000000e+00> : vector<16x8xf32>
    %7 = tpu.matmul %4, %6, %cst {dimension_numbers = #tpu.dot_dimension_numbers<[1], [1], [0], [0], [0, 0, 1, 0], [], []>, precision = #tpu.contract_precision<fp32>} : vector<16x16xf32>, vector<8x16xf32>, vector<16x8xf32> -> vector<16x8xf32>
    %c0_6 = arith.constant 0 : index
    %c0_7 = arith.constant 0 : index
    %c0_8 = arith.constant 0 : index
    %8 = vector.load %arg5[%c0_6, %c0_7, %c0_8] : memref<1x16x8xf32, #tpu.memory_space<vmem>>, vector<1x16x8xf32>
    %9 = vector.shape_cast %8 : vector<1x16x8xf32> to vector<16x8xf32>
    %10 = vector.shape_cast %7 : vector<16x8xf32> to vector<1x16x8xf32>
    tpu.vector_store %arg5[%c0_6, %c0_7, %c0_8], %10 {strides = array<i32>} : memref<1x16x8xf32, #tpu.memory_space<vmem>>, vector<1x16x8xf32>,
    %c0_9 = arith.constant 0 : index
    %c0_10 = arith.constant 0 : index
    %11 = vector.load %arg7[%c0_9, %c0_10] : memref<8x8xf32, #tpu.memory_space<vmem>>, vector<8x8xf32>
    %c0_11 = arith.constant 0 : index
    %c0_12 = arith.constant 0 : index
    %c0_13 = arith.constant 0 : index
    %12 = vector.load %arg4[%c0_11, %c0_12, %c0_13] : memref<1x8x16xf32, #tpu.memory_space<vmem>>, vector<1x8x16xf32>
    %13 = vector.shape_cast %12 : vector<1x8x16xf32> to vector<8x16xf32>
    %cst_14 = arith.constant dense<0.000000e+00> : vector<8x8xf32>
    %14 = tpu.matmul %13, %7, %cst_14 {dimension_numbers = #tpu.dot_dimension_numbers<[1], [0], [0], [1], [0, 0, 1, 1], [], []>, precision = #tpu.contract_precision<fp32>} : vector<8x16xf32>, vector<16x8xf32>, vector<8x8xf32> -> vector<8x8xf32>
    %15 = arith.addf %11, %14 : vector<8x8xf32>
    %c0_15 = arith.constant 0 : index
    %c0_16 = arith.constant 0 : index
    %16 = vector.load %arg7[%c0_15, %c0_16] : memref<8x8xf32, #tpu.memory_space<vmem>>, vector<8x8xf32>
    tpu.vector_store %arg7[%c0_15, %c0_16], %15 {strides = array<i32>} : memref<8x8xf32, #tpu.memory_space<vmem>>, vector<8x8xf32>,
    %c0_i32_17 = arith.constant 0 : i32
    %17 = arith.cmpi eq, %arg1, %c0_i32_17 : i32
    %18 = arith.extui %17 : i1 to i32
    %c0_i32_18 = arith.constant 0 : i32
    %19 = arith.cmpi ne, %18, %c0_i32_18 : i32
    scf.if %19 {
      %c0_19 = arith.constant 0 : index
      %c0_20 = arith.constant 0 : index
      %20 = vector.load %arg7[%c0_19, %c0_20] : memref<8x8xf32, #tpu.memory_space<vmem>>, vector<8x8xf32>
      %c0_21 = arith.constant 0 : index
      %c0_22 = arith.constant 0 : index
      %c0_23 = arith.constant 0 : index
      %21 = vector.load %arg6[%c0_21, %c0_22, %c0_23] : memref<1x8x8xf32, #tpu.memory_space<vmem>>, vector<1x8x8xf32>
      %22 = vector.shape_cast %21 : vector<1x8x8xf32> to vector<8x8xf32>
      %23 = vector.shape_cast %20 : vector<8x8xf32> to vector<1x8x8xf32>
      tpu.vector_store %arg6[%c0_21, %c0_22, %c0_23], %23 {strides = array<i32>} : memref<1x8x8xf32, #tpu.memory_space<vmem>>, vector<1x8x8xf32>,
    } else {
    }
    return
  }
  func.func @transform_0(%arg0: i32, %arg1: i32) -> (i32, i32, i32) {
    %c0_i32 = arith.constant 0 : i32
    %c0_i32_0 = arith.constant 0 : i32
    return %arg0, %arg1, %c0_i32 : i32, i32, i32
  }
  func.func @transform_1(%arg0: i32, %arg1: i32) -> (i32, i32, i32) {
    %c0_i32 = arith.constant 0 : i32
    %c0_i32_0 = arith.constant 0 : i32
    %c0_i32_1 = arith.constant 0 : i32
    return %arg0, %c0_i32, %c0_i32_0 : i32, i32, i32
  }
  func.func @transform_2(%arg0: i32, %arg1: i32) -> (i32, i32, i32) {
    %c0_i32 = arith.constant 0 : i32
    %c0_i32_0 = arith.constant 0 : i32
    return %arg0, %c0_i32, %arg1 : i32, i32, i32
  }
  func.func @transform_3(%arg0: i32, %arg1: i32) -> (i32, i32, i32) {
    %c0_i32 = arith.constant 0 : i32
    %c0_i32_0 = arith.constant 0 : i32
    return %arg0, %arg1, %c0_i32 : i32, i32, i32
  }
  func.func @transform_4(%arg0: i32, %arg1: i32) -> (i32, i32, i32) {
    %c0_i32 = arith.constant 0 : i32
    %c0_i32_0 = arith.constant 0 : i32
    %c0_i32_1 = arith.constant 0 : i32
    return %arg0, %c0_i32, %c0_i32_0 : i32, i32, i32
  }
}

</mosaic_0001>

<bundles_post_ra>
// kernel: tpu_custom_call.1
= control target key start
LH: loop header
LB: loop body
LE: loop exit
PB: predicated region body
PF: predicated region fallthrough
CT: control target
= control target key end

     0   :  { %s1383_s0 = inlined_call_operand.hbm [shape: f32[3,16,16], index: 0, kind: input, shape index: {}]   ;;  %s1384_s1 = inlined_call_operand.hbm [shape: f32[3,8,16], index: 1, kind: input, shape index: {}]   ;;  %s1385_s2 = inlined_call_operand.hbm [shape: f32[3,8,16], index: 2, kind: input, shape index: {}]   ;;  %s1386_s3 = inlined_call_operand.vmem [shape: f32[3,16,8], index: 3, kind: output, shape index: {0}]   ;;  %s1387_s4 = inlined_call_operand.hbm [shape: f32[3,8,8], index: 4, kind: output, shape index: {1}]  }
   0x1   :  { %1392 = sst [smem:[#allocation17_spill]] %s1384_s1 }
   0x2   :  { %1393 = sst [smem:[#allocation18_spill]] %s1385_s2 }
   0x3   :  { %10 = vsyncpa [#allocation4], 0 }
   0x4   :  { %12 = vsyncpa [#allocation4 + $0x1], 0 }
   0x5   :  { %13 = vsyncpa [#allocation7], 0 }
   0x6   :  { %15 = vsyncpa [#allocation7 + $0x1], 0 }
   0x7   :  { %16 = vsyncpa [#allocation5], 0 }
   0x8   :  { %18 = vsyncpa [#allocation5 + $0x1], 0  ;;  %s1203_s15 = smov 0   ;;  %s1205_s16 = smov 0  }
   0x9   :  { %s1207_s17 = smov 0   ;;  %s1209_s18 = smov 0  }
   0xa   :  { %s1211_s19 = smov 0   ;;  %s1213_s20 = smov 0  }
   0xb LB: > { %1394 = sst [smem:[#allocation13_spill]] %s1161_s17  ;;  %s1234_s21 = sadd.s32 4294967295, %s1173_s20   ;;  %s1173_s20 = sphi %s1213_s20, %s24_s20   ;;  %s1169_s19 = sphi %s1211_s19, %s1414_s19   ;;  %s1165_s18 = sphi %s1209_s18, %s1413_s18   ;;  %s1161_s17 = sphi %s1207_s17, %s1409_s17   ;;  %s1157_s16 = sphi %s1205_s16, %s1412_s16   ;;  %s1153_s15 = sphi %s1203_s15, %s1411_s15  }
   0xc   : > { %s899_s22 = sadd.s32 4294967294, %s1173_s20   ;;  %s36_s23 = sadd.s32 1, %s1169_s19 }
   0xd   : > { %s45_s24 = sadd.s32 1, %s1161_s17  ;;  %p38_p0 = scmp.ge.s32.totalorder %s36_s23, 3 }
   0xe   : > { %p52_p1 = scmp.ne.s32.totalorder %s1161_s17, %s1157_s16  ;;  %p53_p2 = scmp.eq.s32.totalorder %s1173_s20, 0 }
   0xf   : > { %p58_p3 = scmp.ne.s32.totalorder %s1157_s16, %s1153_s15  ;;  %s1416_s23 = smov (%p38_p0, %s36_s23), 0 }
  0x10   : > { %1395 = sst [smem:[#allocation14_spill]] %s1416_s23  ;;  %p1246_p4 = por %p53_p2, %p52_p1 }
  0x11   : > { %p59_p5 = scmp.eq.s32.totalorder %s1234_s21, 0  ;;  %s40_s26 = ssub.s32 %s1169_s19, %s1416_s23 }
  0x12   : > { %p164_p6 = scmp.eq.s32.totalorder %s1234_s21, 2  ;;  %p43_p7 = scmp.eq.s32.totalorder %s40_s26, 0 }
  0x13   : > { %p1254_p8 = por %p59_p5, %p58_p3  ;;  %p170_p10 = scmp.eq.s32.totalorder %s899_s22, 2 }
  0x14   : > { %p1258_p9 = por %p164_p6, %p52_p1  ;;  %p944_p12 = scmp.lt.s32.totalorder %s1173_s20, 3 }
  0x15   : > { %s1263_s29 = scalar_select %p43_p7, %s1161_s17, %s45_s24  }
  0x16   : > { %p1265_p11 = por %p170_p10, %p58_p3  ;;  %s1271_s5 = sand.u32 1, %s1161_s17  }
  0x17   : > { %1399 = sst [smem:[#allocation15_spill]] %s1263_s29  ;;  %s214_s6 = sand.u32 1, %s1173_s20  }
  0x18   : > { %s1400_s30 = scalar_select %p1265_p11, 1, 0 }
  0x19   : > { %s1389_s7 = sshll.u32 %s1271_s5, 3  ;;  %p1277_p13 = pnand %p944_p12, %p1246_p4 }
  0x1a   : > { %1401 = sst [smem:[#allocation16_spill]] %s1400_s30  ;;  %s906_s9 = sshll.u32 %s1169_s19, 3 }
  0x1b   : > { %s1403_s1 = sld [smem:[#allocation17_spill]]  ;;  %s218_s14 = scalar_lea.vmem [#allocation6], %s1389_s7 }
  0x1c   : > { %s226_s22 = sshll.u32 %s218_s14, 4  ;;  %s215_s24 = scalar_lea.sflag [#allocation7], %s214_s6  ;;  %s227_s22 = int_to_ptr.vmem [resolvable:$true] %s226_s22 }
  0x1d   : > { %s1404_s2 = sld [smem:[#allocation18_spill]]  ;;  %p909_p0 = scmp.ge.s32.totalorder %s1173_s20, 1 }
  0x1e   : > { %p251_p1 = scmp.lt.s32.totalorder %s1173_s20, 4  ;;  %s902_s11 = sshll.u32 %s1271_s5, 4 }
  0x1f   : > { %s1175_s25 = smov 128   ;;  %s1176_s26 = smov 8  }
  0x20   : > { %p1294_p2 = pnand %p909_p0, %p251_p1  ;;  %s1406_s29 = sshll.u32 %s1271_s5, 3 }
  0x21   : > { %s222_s12 = scalar_lea.hbm %s1403_s1, %s906_s9  ;;  %s237_s17 = scalar_lea.vmem [#allocation8], %s1406_s29 }
  0x22   : > { %s224_s13 = sshll.u32 %s222_s12, 4  ;;  %s920_s12 = sshll.u32 %s1169_s19, 4  ;;  %s225_s13 = int_to_ptr.hbm [resolvable:$true] %s224_s13 }
  0x23   : > { %936 = dma.hbm_to_vmem [thread:$0]  (!%p1277_p13), %s225_s13, 128, %s227_s22, %s215_s24  }
  0x24   : > { %s242_s23 = scalar_lea.hbm %s1404_s2, %s906_s9  ;;  %s201_s6 = scalar_lea.hbm %s1383_s0, %s920_s12 }
  0x25   : > { %s202_s13 = sshll.u32 %s201_s6, 4  ;;  %s194_s22 = scalar_lea.vmem [#allocation3], %s902_s11  ;;  %s203_s13 = int_to_ptr.hbm [resolvable:$true] %s202_s13 }
  0x26   : > { %s204_s1 = sshll.u32 %s194_s22, 4  ;;  %s191_s9 = scalar_lea.sflag [#allocation4], %s1271_s5  ;;  %s205_s1 = int_to_ptr.vmem [resolvable:$true] %s204_s1 }
  0x27   : > { %933 = dma.hbm_to_vmem [thread:$0]  (!%p1277_p13), %s203_s13, 256, %s205_s1, %s191_s9, %s1175_s25, %s1175_s25, %s1176_s26  }
  0x28   : > { %s244_s2 = sshll.u32 %s242_s23, 4  ;;  %s246_s30 = sshll.u32 %s237_s17, 4  ;;  %s245_s2 = int_to_ptr.hbm [resolvable:$true] %s244_s2  ;;  %s247_s30 = int_to_ptr.vmem [resolvable:$true] %s246_s30 }
  0x29   : > { %939 = dma.hbm_to_vmem [thread:$0]  (!%p1277_p13), %s245_s2, 128, %s247_s30, %s215_s24  }
  0x2a   : > { %255 = sbr.rel (%p1294_p2) target bundleno = 390 (0x186), region = 32  ;;  %s1313_s7 = sand.u32 (!%p1294_p2), 1, %s1157_s16  }
  0x2b   : > { %s910_s11 = sshll.u32 (!%p1294_p2), %s1313_s7, 4  ;;  %s258_s12 = scalar_lea.sflag (!%p1294_p2), [#allocation4], %s1313_s7 }
  0x2c   : > { %s261_s1 = scalar_lea.vmem (!%p1294_p2), [#allocation3], %s910_s11 }
  0x2f   : > { %1140 = dma.done.wait (%p1254_p8), %s258_s12, 256  }
  0x30   : > { %1142 = vsyncadd (%p1254_p8), %s258_s12, 4294967040  ;;  %s267_s2 = sand.u32 1, %s1234_s21   ;;  %s1323_s17 = sshll.u32 %s1313_s7, 3 }
  0x31   : > { %s268_s23 = scalar_lea.sflag [#allocation7], %s267_s2  ;;  %s271_s29 = scalar_lea.vmem [#allocation6], %s1323_s17 }
  0x32   : > { %1144 = dma.done.wait (%p1254_p8), %s268_s23, 256  }
  0x33   : > { %1146 = vsyncadd (%p1254_p8), %s268_s23, 4294967040  ;;  %vm346_vm0 = vcmask 130048   ;;  %v345_v0 = vld [vmem:[%s271_s29] sm:$0xff]  ;;  %v344_v2 = vld [vmem:[%s261_s1 + $0x8] sm:$0xff]  ;;  %p328_p3 = scmp.lt.s32.totalorder %s1165_s18, 2  ;;  %s281_s21 = scalar_lea.vmem [#allocation8], %s1323_s17 }
  0x34   : > { %v343_v1 = vld [vmem:[%s261_s1] sm:$0xff]  ;;  %v354_v3 = vsel %vm346_vm0, %v345_v0, 0  ;;  %v351_v5 = vsel %vm346_vm0, %v344_v2, 0  ;;  %v537_v27 = vld [vmem:[%s281_s21] sm:$0xff]  ;;  %vm341_vm1 = vcmask 64512   ;;  %v1177_v60 = vmov 0.0  }
  0x35   : > { %v348_v4 = vsel %vm346_vm0, %v343_v1, 0  ;;  %v371_v6 = vand.u32 4294901760, %v354_v3  ;;  %v381_v8 = vand.u32 4294901760, %v351_v5  ;;  %s329_s27 = scalar_select %p328_p3, %s1165_s18, 2  ;;  %v539_v30 = vsel %vm346_vm0, %v537_v27, 0  ;;  %342 = vst.msk [vmem:[#allocation2] sm:$0xff] %vm341_vm1, %v1177_v60 }
  0x36   : > { %v373_v7 = vand.u32 4294901760, %v348_v4  ;;  %v559_v35 = vand.u32 4294901760, %v539_v30  ;;  %s917_s10 = sshll.u32 %s1165_s18, 3  ;;  %s325_s22 = scalar_lea.vmem [#allocation9], %s1323_s17 }
  0x37   : > { %v406_v9 = vsub.f32 %v354_v3, %v371_v6  ;;  %372 = vmatpush.xpose.msra.mxu0 %v371_v6  ;;  %465 = vmatpush.xpose.msra.mxu3 %v371_v6  ;;  %v382_v11 = vsub.f32 %v351_v5, %v381_v8  ;;  %s921_s30 = sshll.u32 %s329_s27, 4  ;;  %s731_s13 = scalar_lea.hbm %s1387_s4, %s917_s10 }
  0x38   : > { %v374_v10 = vsub.f32 %v348_v4, %v373_v7  ;;  %s335_s24 = scalar_lea.vmem %s1386_s3, %s921_s30  ;;  %v560_v41 = vsub.f32 %v539_v30, %v559_v35  ;;  %s733_s9 = sshll.u32 %s325_s22, 4  ;;  %s734_s9 = int_to_ptr.vmem [resolvable:$true] %s733_s9 }
  0x39   : > { %437 = vmatpush.xpose.msra.mxu2 %v406_v9  ;;  %v407_v13 = vand.u32 4294901760, %v406_v9  ;;  %v383_v16 = vand.u32 4294901760, %v382_v11  ;;  %s735_s25 = sshll.u32 %s731_s13, 4  ;;  %s717_s26 = scalar_lea.sflag [#allocation5], %s1313_s7  ;;  %s736_s25 = int_to_ptr.hbm [resolvable:$true] %s735_s25 }
  0x3a   : > { %v375_v12 = vand.u32 4294901760, %v374_v10  ;;  %v561_v45 = vand.u32 4294901760, %v560_v41  ;;  %s1101_s11 = sshra.s32 %s736_s25, 4  ;;  %s1107_s2 = scalar_lea.hbm %s1387_s4, 24  ;;  %s1102_s11 = int_to_ptr.hbm [resolvable:$true] %s1101_s11 }
  0x3b   : > { %v408_v15 = vsub.f32 %v406_v9, %v407_v13  ;;  %497 = vmatpush.xpose.msrb.mxu0 %v407_v13  ;;  %v384_v19 = vsub.f32 %v382_v11, %v383_v16  ;;  %s1103_s18 = scalar_lea.hbm %s1102_s11, 8  ;;  %p1108_p7 = scmp.lt.s32.totalorder %s1102_s11, %s1387_s4 }
  0x3c   : > { %v376_v14 = vsub.f32 %v374_v10, %v375_v12  ;;  %469 = vmatmul.f32.vlgmr.msra.gmra.mxu3 %v375_v12  ;;  %440 = vmatmul.f32.vlgmr.msra.gmra.mxu2 %v374_v10  ;;  %v562_v50 = vsub.f32 %v560_v41, %v561_v45  ;;  %p1104_p4 = scmp.ne.s32.totalorder %s1102_s11, %s1103_s18  ;;  %p1109_p8 = scmp.lt.s32.totalorder %s1107_s2, %s1103_s18 }
  0x3d   : > { %v409_v18 = vand.u32 4294901760, %v408_v15  ;;  %v385_v20 = vand.u32 4294901760, %v384_v19 }
  0x3e   : > { %v377_v17 = vand.u32 4294901760, %v376_v14  ;;  %v563_v54 = vand.u32 4294901760, %v562_v50  ;;  %p1105_p5 = pnand %p1104_p4, %p1258_p9  ;;  %p1110_p10 = por %p1109_p8, %p1108_p7 }
  0x3f   : > { %410 = vmatpush.xpose.msra.mxu1 %v409_v18 }
  0x40   : > { %378 = vmatmul.f32.vlgmr.msra.gmra.mxu0 %v377_v17  ;;  %p1106_p6 = pneg %p1105_p5 }
  0x42   : > { %412 = vmatmul.f32.vlgmr.msra.gmra.mxu1 %v373_v7  ;;  %p1111_p12 = pnand %p1110_p10, %p1106_p6 }
  0x43   : > { %523 = vmatpush.xpose.msrb.mxu1 %v371_v6 }
  0x44   : > { %475 = vmatmul.f32.gmra.mxu3 %v383_v16  ;;  %445 = vmatmul.f32.gmra.mxu2 %v382_v11 }
  0x48   : > { %386 = vmatmul.f32.gmra.mxu0 %v385_v20 }
  0x4a   : > { %416 = vmatmul.f32.gmra.mxu1 %v381_v8 }
  0x50   : > { %499 = vmatmul.f32.vlgmr.msrb.gmra.mxu0 %v373_v7 }
  0x52   : > { %525 = vmatmul.f32.vlgmr.msrb.gmra.mxu1 %v373_v7  ;;  %v536_v7 = vld [vmem:[#allocation2] sm:$0xff] }
  0x58   : > { %503 = vmatmul.f32.gmra.mxu0 %v381_v8 }
  0x5a   : > { %529 = vmatmul.f32.gmra.mxu1 %v381_v8 }
  0xbd   : > { %v379_v21 = vpop.f32.mrf.mxu0 }
  0xbf   : > { %v413_v22 = vpop.f32.mrf.mxu1  ;;  %v441_v23 = vpop.f32.mrf.mxu2 }
  0xc0   : > { %v414_v24 = vadd.f32 %v413_v22, %v379_v21  ;;  %v470_v26 = vpop.f32.mrf.mxu3 }
  0xc2   : > { %v442_v28 = vadd.f32 %v441_v23, %v414_v24 }
  0xc4   : > { %v471_v31 = vadd.f32 %v470_v26, %v442_v28 }
  0xc5   : > { %v387_v25 = vpop.f32.mrf.mxu0 }
  0xc7   : > { %v417_v29 = vpop.f32.mrf.mxu1  ;;  %v446_v33 = vpop.f32.mrf.mxu2 }
  0xc8   : > { %v418_v32 = vadd.f32 %v417_v29, %v387_v25  ;;  %v476_v39 = vpop.f32.mrf.mxu3 }
  0xca   : > { %v447_v37 = vadd.f32 %v446_v33, %v418_v32 }
  0xcc   : > { %v477_v42 = vadd.f32 %v476_v39, %v447_v37 }
  0xcd   : > { %v500_v34 = vpop.f32.mrf.mxu0 }
  0xce   : > { %v501_v36 = vadd.f32 %v500_v34, %v471_v31 }
  0xcf   : > { %v526_v38 = vpop.f32.mrf.mxu1 }
  0xd0   : > { %v527_v40 = vadd.f32 %v526_v38, %v501_v36 }
  0xd2   : > { %534 = vst.msk [vmem:[%s335_s24] sm:$0xff] %vm341_vm1, %v527_v40  ;;  %v557_v43 = vand.u32 4294901760, %v527_v40 }
  0xd4   : > { %v589_v49 = vsub.f32 %v527_v40, %v557_v43 }
  0xd5   : > { %v504_v44 = vpop.f32.mrf.mxu0 }
  0xd6   : > { %v505_v46 = vadd.f32 %v504_v44, %v477_v42  ;;  %v590_v53 = vand.u32 4294901760, %v589_v49 }
  0xd7   : > { %v530_v47 = vpop.f32.mrf.mxu1 }
  0xd8   : > { %v531_v48 = vadd.f32 %v530_v47, %v505_v46  ;;  %v591_v57 = vsub.f32 %v589_v49, %v590_v53 }
  0xda   : > { %535 = vst.msk [vmem:[%s335_s24 + $0x8] sm:$0xff] %vm341_vm1, %v531_v48  ;;  %v555_v51 = vand.u32 4294901760, %v531_v48  ;;  %v592_v59 = vand.u32 4294901760, %v591_v57 }
  0xdc   : > { %v583_v52 = vsub.f32 %v531_v48, %v555_v51  ;;  %556 = vmatpush.msrb.mxu2 %v555_v51  ;;  %692 = vmatpush.msra.mxu1 %v555_v51 }
  0xde   : > { %558 = vmatpush.msrb.mxu2 %v557_v43  ;;  %694 = vmatpush.msra.mxu1 %v557_v43  ;;  %v584_v55 = vand.u32 4294901760, %v583_v52 }
  0xdf   : > { %696 = vmatmul.f32.vlgmr.msra.gmra.mxu1 %v559_v35  ;;  %564 = vmatmul.f32.vlgmr.msrb.gmra.mxu2 %v563_v54 }
  0xe0   : > { %615 = vmatpush.msra.mxu2 %v583_v52  ;;  %667 = vmatpush.msra.mxu0 %v584_v55  ;;  %v585_v56 = vsub.f32 %v583_v52, %v584_v55 }
  0xe2   : > { %618 = vmatpush.msra.mxu2 %v589_v49  ;;  %671 = vmatpush.msra.mxu0 %v590_v53  ;;  %v586_v58 = vand.u32 4294901760, %v585_v56 }
  0xe3   : > { %673 = vmatmul.f32.vlgmr.msra.gmra.mxu0 %v559_v35 }
  0xe4   : > { %587 = vmatpush.msrb.mxu3 %v586_v58 }
  0xe6   : > { %593 = vmatpush.msrb.mxu3 %v592_v59 }
  0xe7   : > { %595 = vmatmul.f32.vlgmr.msrb.gmra.mxu3 %v559_v35  ;;  %621 = vmatmul.f32.vlgmr.msra.gmra.mxu2 %v560_v41 }
  0xe8   : > { %640 = vmatpush.msra.mxu3 %v555_v51 }
  0xea   : > { %642 = vmatpush.msra.mxu3 %v557_v43 }
  0xef   : > { %646 = vmatmul.f32.vlgmr.msra.gmra.mxu3 %v561_v45 }
 0x15c   : > { %v697_v5 = vpop.f32.mrf.mxu1 }
 0x160   : > { %v674_v3 = vpop.f32.mrf.mxu0 }
 0x162   : > { %v565_v61 = vpop.f32.mrf.mxu2 }
 0x16a   : > { %v596_v62 = vpop.f32.mrf.mxu3  ;;  %v622_v0 = vpop.f32.mrf.mxu2 }
 0x16b   : > { %v597_v63 = vadd.f32 %v596_v62, %v565_v61 }
 0x16d   : > { %v623_v1 = vadd.f32 %v622_v0, %v597_v63 }
 0x172   : > { %v647_v2 = vpop.f32.mrf.mxu3 }
 0x173   : > { %v648_v4 = vadd.f32 %v647_v2, %v623_v1 }
 0x175   : > { %v675_v6 = vadd.f32 %v674_v3, %v648_v4 }
 0x177   : > { %v698_v8 = vadd.f32 %v697_v5, %v675_v6 }
 0x179   : > { %v700_v9 = vadd.f32 %v698_v8, %v536_v7 }
 0x17b   : > { %701 = vst.msk [vmem:[#allocation2] sm:$0xff] %vm341_vm1, %v700_v9 }
 0x182   : > { %v705_v10 = vld [vmem:[#allocation2] sm:$0xff] }
 0x183   : > { %706 = vst.msk [vmem:[%s325_s22] sm:$0xff] %vm341_vm1, %v705_v10 }
 0x184   : > { %1114 = shalt.err (!%p1111_p12)
}
 0x185   : > { %928 = dma.vmem_to_hbm [thread:$0]  (%p1258_p9), %s734_s9, 128, %s736_s25, %s717_s26  }
 0x186 PF: > { %p945_p13 = scmp.ge.s32.totalorder %s1173_s20, 2  ;;  %s759_s29 = sand.u32 1, %s1153_s15  }
 0x187   : > { %s760_s21 = scalar_lea.sflag [#allocation5], %s759_s29 }
 0x188   : > { %p941_p0 = pnand %p945_p13, %p1265_p11 }
 0x18a   : > { %p942_p1 = pneg %p941_p0 }
 0x18c   : > { %1148 = dma.done.wait (%p942_p1), %s760_s21, 128  }
 0x18d   : > { %1150 = vsyncadd (%p942_p1), %s760_s21, 4294967168  ;;  %s24_s20 = sadd.s32 1, %s1173_s20   ;;  %s1408_s27 = sld [smem:[#allocation13_spill]] }
 0x18e   : > { %p21_p2 = scmp.ge.s32.totalorder %s24_s20, 5   ;;  %s1409_s17 = sld [smem:[#allocation15_spill]] }
 0x18f   : > { %s1410_s28 = sld [smem:[#allocation14_spill]]  ;;  %s1411_s15 = smov %s1157_s16 }
 0x190   : > { %s1413_s18 = smov %s1169_s19 }
 0x191   :  { %23 = sbr.rel (!%p21_p2) target bundleno = 11 (0xb), region = 121 }
 0x193   : > { %s1412_s16 = smov %s1408_s27 }
 0x195   : > { %s1414_s19 = smov %s1410_s28 }
 0x196   :  { %766 = vsyncpa [#allocation4], 1 }
 0x197   :  { %768 = vsyncpa [#allocation4 + $0x1], 1 }
 0x198   :  { %769 = vsyncpa [#allocation7], 1 }
 0x199   :  { %771 = vsyncpa [#allocation7 + $0x1], 1 }
 0x19a   :  { %772 = vsyncpa [#allocation5], 1 }
 0x19b   :  { %774 = vsyncpa [#allocation5 + $0x1], 1 }

</bundles_post_ra>
